<compile_context>
chip_gen: v6e
topology: v6e:2x2x1
jax: 0.10.0
libtpu: 0.0.40
codegen_flags: <defaults>
</compile_context>

<pallas_src>
import functools

import jax
import jax.numpy as jnp
from jax import lax
from jax.experimental import pallas as pl
from jax.experimental.pallas import tpu as pltpu

L2_EPS = 1e-12   # torch.nn.functional.normalize default eps


# ---------------------------------------------------------------------------
# Kernel: per edge-tile gather (scalar-prefetched indices + dynamic row loads)
# -> per-edge dot products -> stable BCE-with-logits partial sum accumulated
# across the grid -> scalar mean loss in SMEM on the last step.
# ---------------------------------------------------------------------------
def _co_loss_kernel(meta_ref, idx_ref,            # scalar prefetch (SMEM)
                    z_ref, params_ref,            # inputs (VMEM / SMEM)
                    out_ref,                      # output (SMEM scalar)
                    xj_ref, xi_ref, acc_ref,      # VMEM scratch
                    *, sig_contrast, norm_contrast):
    t = pl.program_id(0)
    num_tiles = pl.num_programs(0)
    te = xj_ref.shape[0]

    @pl.when(t == 0)
    def _init():
        acc_ref[...] = jnp.zeros_like(acc_ref)

    base = t * te

    # Gather this tile's edge endpoints. Indices live in SMEM; rows are copied
    # from the VMEM-resident z with dynamic leading-axis indexing (no one-hot,
    # no MXU involvement).
    def gather_one(e, carry):
        s = idx_ref[0, base + e]      # source node  -> x_j
        d = idx_ref[1, base + e]      # target node  -> x_i
        xj_ref[e] = z_ref[s]
        xi_ref[e] = z_ref[d]
        return carry

    lax.fori_loop(0, te, gather_one, 0)

    x_j = xj_ref[...]                 # (te, 1, D) float32
    x_i = xi_ref[...]

    # Optional transforms on x_j (args.sig_contrast / args.norm_contrast),
    # resolved statically at trace time; sigmoid first, then L2-normalize.
    if sig_contrast:
        x_j = jax.nn.sigmoid(x_j)
    if norm_contrast:
        ssq = jnp.sum(x_j * x_j, axis=-1, keepdims=True)
        # x / max(||x||, eps)  ==  x * rsqrt(max(||x||^2, eps^2))  (EUP rsqrt)
        x_j = x_j * lax.rsqrt(jnp.maximum(ssq, L2_EPS * L2_EPS))

    inv_mu = params_ref[0]
    # Per-edge logits; fold 1/mu in after the reduction (E ops, not E*D).
    logits = jnp.sum(x_i * x_j, axis=-1) * inv_mu          # (te, 1)

    e_pos = meta_ref[0]
    e_total = meta_ref[1]
    edge_id = base + lax.broadcasted_iota(jnp.int32, logits.shape, 0)
    labels = (edge_id < e_pos).astype(jnp.float32)
    valid = (edge_id < e_total).astype(jnp.float32)        # mask padded edges

    # Numerically stable BCE-with-logits (PyTorch formulation):
    #   max(l, 0) - l*y + log(1 + exp(-|l|))
    per_edge = (jnp.maximum(logits, 0.0) - logits * labels
                + jnp.log(1.0 + jnp.exp(-jnp.abs(logits)))) * valid
    acc_ref[...] += jnp.sum(per_edge, keepdims=True)       # (1, 1) partial sum

    @pl.when(t == num_tiles - 1)
    def _finalize():
        out_ref[0, 0] = jnp.sum(acc_ref[...]) / e_total.astype(jnp.float32)


# ---------------------------------------------------------------------------
# CO.forward wrapper
# ---------------------------------------------------------------------------
def co_forward(z_tuple, pos_edge_index, neg_edge_index, mu=1.0,
               sig_contrast=False, norm_contrast=False, edge_tile=128):
    z, _ = z_tuple
    z = jnp.asarray(z, jnp.float32)
    n, d = z.shape

    e_pos = int(pos_edge_index.shape[1])
    e_neg = int(neg_edge_index.shape[1])
    e_total = e_pos + e_neg

    te = int(max(1, min(int(edge_tile), e_total)))
    num_tiles = int(pl.cdiv(e_total, te))
    e_pad = num_tiles * te

    # Concatenated edge list, [2, E_pad] int32 (E rides the long/last axis).
    total = jnp.concatenate([pos_edge_index, neg_edge_index],
                            axis=-1).astype(jnp.int32)
    if e_pad != e_total:
        total = jnp.pad(total, ((0, 0), (0, e_pad - e_total)))   # pad w/ node 0

    meta = jnp.array([e_pos, e_total], dtype=jnp.int32)          # SMEM scalars
    params = (1.0 / jnp.asarray(mu, jnp.float32)).reshape(1)     # [inv_mu]

    # Leading-axis rows -> clean dynamic row indexing inside the kernel.
    z3 = z.reshape(n, 1, d)

    kernel = functools.partial(_co_loss_kernel,
                               sig_contrast=bool(sig_contrast),
                               norm_contrast=bool(norm_contrast))

    # Size the scoped VMEM limit from the real footprint (double-buffered z
    # block + two staging tiles), capped at 64 MiB (v7x physical).
    lane_d = ((d + 127) // 128) * 128
    z_block_bytes = n * 8 * lane_d * 4
    stage_bytes = 2 * te * 8 * lane_d * 4
    vmem_limit = int(min(64 << 20,
                         max(32 << 20,
                             2 * z_block_bytes + 2 * stage_bytes + (4 << 20))))

    grid_spec = pltpu.PrefetchScalarGridSpec(
        num_scalar_prefetch=2,                     # meta, edge indices -> SMEM
        grid=(num_tiles,),
        in_specs=[
            pl.BlockSpec((n, 1, d), lambda t, meta, idx: (0, 0, 0)),   # z
            pl.BlockSpec(memory_space=pltpu.MemorySpace.SMEM),         # inv_mu
        ],
        out_specs=pl.BlockSpec(memory_space=pltpu.MemorySpace.SMEM),   # loss
        scratch_shapes=[
            pltpu.VMEM((te, 1, d), jnp.float32),   # gathered x_j tile
            pltpu.VMEM((te, 1, d), jnp.float32),   # gathered x_i tile
            pltpu.VMEM((1, 1), jnp.float32),       # running BCE sum
        ],
    )

    out = pl.pallas_call(
        kernel,
        out_shape=jax.ShapeDtypeStruct((1, 1), jnp.float32),
        grid_spec=grid_spec,
        compiler_params=pltpu.CompilerParams(
            dimension_semantics=("arbitrary",),    # axis carries the accumulator
            vmem_limit_bytes=vmem_limit),
    )(meta, total, z3, params)
    return out[0, 0]


# ---------------------------------------------------------------------------
# Pure-JAX reference (mirrors the PyTorch module) for validation.
# ---------------------------------------------------------------------------
def _reference_loss(z, pos_edge_index, neg_edge_index, mu,
                    sig_contrast, norm_contrast):
    total = jnp.concatenate([pos_edge_index, neg_edge_index], axis=-1)
    x_j = z[total[0]]
    if sig_contrast:
        x_j = jax.nn.sigmoid(x_j)
    if norm_contrast:
        nrm = jnp.sqrt(jnp.sum(x_j * x_j, axis=1, keepdims=True))
        x_j = x_j / jnp.maximum(nrm, 1e-12)
    x_i = z[total[1]]
    logits = jnp.sum(x_i * x_j, axis=1) / mu
    labels = jnp.concatenate(
        [jnp.ones((pos_edge_index.shape[1],), jnp.float32),
         jnp.zeros((neg_edge_index.shape[1],), jnp.float32)])
    per_edge = (jnp.maximum(logits, 0.0) - logits * labels
                + jnp.log1p(jnp.exp(-jnp.abs(logits))))
    return jnp.mean(per_edge)


if __name__ == "__main__":
    import numpy as np

    key = jax.random.PRNGKey(0)
    kz, kp, kn = jax.random.split(key, 3)

    N, D = 32, 32          # nodes, embedding dim
    E_POS, E_NEG = 16, 16  # positive / negative edges

    z = jax.random.normal(kz, (N, D), dtype=jnp.float32)
    pos_edge_index = jax.random.randint(kp, (2, E_POS), 0, N, dtype=jnp.int32)
    neg_edge_index = jax.random.randint(kn, (2, E_NEG), 0, N, dtype=jnp.int32)

    # Default path (sig_contrast=False, norm_contrast=False); 2 edge tiles.
    loss = co_forward((z, None), pos_edge_index, neg_edge_index, mu=1.0,
                      edge_tile=16)
    jax.block_until_ready(loss)
    ref = _reference_loss(z, pos_edge_index, neg_edge_index, 1.0, False, False)
    np.testing.assert_allclose(np.asarray(loss), np.asarray(ref),
                               rtol=1e-3, atol=1e-4)

    # Optional sigmoid + L2-normalize branch; edge_tile=24 exercises the
    # padded / masked last tile and the runtime mu scalar.
    loss2 = co_forward((z, None), pos_edge_index, neg_edge_index, mu=2.0,
                       sig_contrast=True, norm_contrast=True, edge_tile=24)
    jax.block_until_ready(loss2)
    ref2 = _reference_loss(z, pos_edge_index, neg_edge_index, 2.0, True, True)
    np.testing.assert_allclose(np.asarray(loss2), np.asarray(ref2),
                               rtol=1e-3, atol=1e-4)

    print("KERNEL_OK")
</pallas_src>

<mosaic_0001>
module attributes {stable_mosaic.version = 11 : i64} {
  func.func @_co_loss_kernel(%arg0: i32, %arg1: memref<2xi32, #tpu.memory_space<smem>>, %arg2: memref<2x32xi32, #tpu.memory_space<smem>>, %arg3: memref<32x1x32xf32, #tpu.memory_space<vmem>>, %arg4: memref<1xf32, #tpu.memory_space<smem>>, %arg5: memref<1x1xf32, #tpu.memory_space<smem>>, %arg6: memref<16x1x32xf32, #tpu.memory_space<vmem>>, %arg7: memref<16x1x32xf32, #tpu.memory_space<vmem>>, %arg8: memref<1x1xf32, #tpu.memory_space<vmem>>) attributes {dimension_semantics = [#tpu.dimension_semantics<arbitrary>], iteration_bounds = array<i64: 2>, scalar_prefetch = 2 : i64, scratch_operands = 3 : i64, tpu.core_type = #tpu.core_type<tc>, window_params = [{pipeline_mode = #tpu.pipeline_mode<synchronous>, transform_indices = @transform_0, window_bounds = array<i64: 32, 1, 32>}, {transform_indices = @transform_1, window_bounds = array<i64: 1>}, {transform_indices = @transform_2, window_bounds = array<i64: 1, 1>}]} {
    %c0_i32 = arith.constant 0 : i32
    %0 = arith.cmpi eq, %arg0, %c0_i32 : i32
    %1 = arith.extui %0 : i1 to i32
    %c0_i32_0 = arith.constant 0 : i32
    %2 = arith.cmpi ne, %1, %c0_i32_0 : i32
    scf.if %2 {
      %cst_21 = arith.constant 0.000000e+00 : f32
      %49 = vector.broadcast %cst_21 : f32 to vector<1x1xf32>
      %c0_22 = arith.constant 0 : index
      %c0_23 = arith.constant 0 : index
      %50 = vector.load %arg8[%c0_22, %c0_23] : memref<1x1xf32, #tpu.memory_space<vmem>>, vector<1x1xf32>
      tpu.vector_store %arg8[%c0_22, %c0_23], %49 {strides = array<i32>} : memref<1x1xf32, #tpu.memory_space<vmem>>, vector<1x1xf32>,
    } else {
    }
    %c16_i32 = arith.constant 16 : i32
    %3 = arith.muli %arg0, %c16_i32 : i32
    %c0_i32_1 = arith.constant 0 : i32
    %c16_i32_2 = arith.constant 16 : i32
    %4 = arith.addi %c0_i32_1, %c16_i32_2 : i32
    %c1_i32 = arith.constant 1 : i32
    scf.for %arg9 = %c0_i32_1 to %4 step %c1_i32  : i32 {
      %49 = arith.addi %3, %arg9 : i32
      %c0_21 = arith.constant 0 : index
      %50 = arith.index_cast %49 : i32 to index
      %51 = memref.load %arg2[%c0_21, %50] : memref<2x32xi32, #tpu.memory_space<smem>>
      %52 = arith.addi %3, %arg9 : i32
      %c1_22 = arith.constant 1 : index
      %53 = arith.index_cast %52 : i32 to index
      %54 = memref.load %arg2[%c1_22, %53] : memref<2x32xi32, #tpu.memory_space<smem>>
      %55 = arith.index_cast %51 : i32 to index
      %c0_23 = arith.constant 0 : index
      %c0_24 = arith.constant 0 : index
      %56 = vector.load %arg3[%55, %c0_23, %c0_24] : memref<32x1x32xf32, #tpu.memory_space<vmem>>, vector<1x1x32xf32>
      %57 = vector.shape_cast %56 : vector<1x1x32xf32> to vector<1x32xf32>
      %58 = arith.index_cast %arg9 : i32 to index
      %c0_25 = arith.constant 0 : index
      %c0_26 = arith.constant 0 : index
      %59 = vector.load %arg6[%58, %c0_25, %c0_26] : memref<16x1x32xf32, #tpu.memory_space<vmem>>, vector<1x1x32xf32>
      %60 = vector.shape_cast %59 : vector<1x1x32xf32> to vector<1x32xf32>
      %61 = vector.shape_cast %57 : vector<1x32xf32> to vector<1x1x32xf32>
      tpu.vector_store %arg6[%58, %c0_25, %c0_26], %61 {strides = array<i32>} : memref<16x1x32xf32, #tpu.memory_space<vmem>>, vector<1x1x32xf32>,
      %62 = arith.index_cast %54 : i32 to index
      %c0_27 = arith.constant 0 : index
      %c0_28 = arith.constant 0 : index
      %63 = vector.load %arg3[%62, %c0_27, %c0_28] : memref<32x1x32xf32, #tpu.memory_space<vmem>>, vector<1x1x32xf32>
      %64 = vector.shape_cast %63 : vector<1x1x32xf32> to vector<1x32xf32>
      %65 = arith.index_cast %arg9 : i32 to index
      %c0_29 = arith.constant 0 : index
      %c0_30 = arith.constant 0 : index
      %66 = vector.load %arg7[%65, %c0_29, %c0_30] : memref<16x1x32xf32, #tpu.memory_space<vmem>>, vector<1x1x32xf32>
      %67 = vector.shape_cast %66 : vector<1x1x32xf32> to vector<1x32xf32>
      %68 = vector.shape_cast %64 : vector<1x32xf32> to vector<1x1x32xf32>
      tpu.vector_store %arg7[%65, %c0_29, %c0_30], %68 {strides = array<i32>} : memref<16x1x32xf32, #tpu.memory_space<vmem>>, vector<1x1x32xf32>,
    }
    %c16_i32_3 = arith.constant 16 : i32
    %c0 = arith.constant 0 : index
    %c0_4 = arith.constant 0 : index
    %c0_5 = arith.constant 0 : index
    %5 = vector.load %arg6[%c0, %c0_4, %c0_5] : memref<16x1x32xf32, #tpu.memory_space<vmem>>, vector<16x1x32xf32>
    %c0_6 = arith.constant 0 : index
    %c0_7 = arith.constant 0 : index
    %c0_8 = arith.constant 0 : index
    %6 = vector.load %arg7[%c0_6, %c0_7, %c0_8] : memref<16x1x32xf32, #tpu.memory_space<vmem>>, vector<16x1x32xf32>
    %c0_9 = arith.constant 0 : index
    %7 = memref.load %arg4[%c0_9] : memref<1xf32, #tpu.memory_space<smem>>
    %8 = arith.mulf %6, %5 : vector<16x1x32xf32>
    %cst = arith.constant dense<0.000000e+00> : vector<16x1xf32>
    %9 = vector.multi_reduction <add>, %8, %cst [2] : vector<16x1x32xf32> to vector<16x1xf32>
    %10 = vector.broadcast %7 : f32 to vector<16x1xf32>
    %11 = arith.mulf %9, %10 : vector<16x1xf32>
    %c0_10 = arith.constant 0 : index
    %12 = memref.load %arg1[%c0_10] : memref<2xi32, #tpu.memory_space<smem>>
    %c1 = arith.constant 1 : index
    %13 = memref.load %arg1[%c1] : memref<2xi32, #tpu.memory_space<smem>>
    %14 = tpu.iota {dimensions = array<i32: 0>} : vector<16x1xi32>
    %15 = vector.broadcast %3 : i32 to vector<16x1xi32>
    %16 = arith.addi %15, %14 : vector<16x1xi32>
    %17 = vector.broadcast %12 : i32 to vector<16x1xi32>
    %18 = arith.cmpi slt, %16, %17 : vector<16x1xi32>
    %19 = arith.extui %18 : vector<16x1xi1> to vector<16x1xi32>
    %20 = arith.sitofp %19 : vector<16x1xi32> to vector<16x1xf32>
    %21 = vector.broadcast %13 : i32 to vector<16x1xi32>
    %22 = arith.cmpi slt, %16, %21 : vector<16x1xi32>
    %23 = arith.extui %22 : vector<16x1xi1> to vector<16x1xi32>
    %24 = arith.sitofp %23 : vector<16x1xi32> to vector<16x1xf32>
    %cst_11 = arith.constant 0.000000e+00 : f32
    %25 = vector.broadcast %cst_11 : f32 to vector<16x1xf32>
    %26 = arith.maximumf %11, %25 : vector<16x1xf32>
    %27 = arith.mulf %11, %20 : vector<16x1xf32>
    %28 = arith.subf %26, %27 : vector<16x1xf32>
    %29 = math.absf %11 : vector<16x1xf32>
    %cst_12 = arith.constant 0.000000e+00 : f32
    %30 = vector.broadcast %cst_12 : f32 to vector<16x1xf32>
    %31 = arith.subf %30, %29 : vector<16x1xf32>
    %32 = math.exp %31 : vector<16x1xf32>
    %cst_13 = arith.constant 1.000000e+00 : f32
    %33 = vector.broadcast %cst_13 : f32 to vector<16x1xf32>
    %34 = arith.addf %33, %32 : vector<16x1xf32>
    %35 = math.log %34 : vector<16x1xf32>
    %36 = arith.addf %28, %35 : vector<16x1xf32>
    %37 = arith.mulf %36, %24 : vector<16x1xf32>
    %c0_14 = arith.constant 0 : index
    %c0_15 = arith.constant 0 : index
    %38 = vector.load %arg8[%c0_14, %c0_15] : memref<1x1xf32, #tpu.memory_space<vmem>>, vector<1x1xf32>
    %39 = vector.shape_cast %37 : vector<16x1xf32> to vector<1x16x1xf32>
    %cst_16 = arith.constant dense<0.000000e+00> : vector<1xf32>
    %40 = vector.multi_reduction <add>, %39, %cst_16 [1, 2] : vector<1x16x1xf32> to vector<1xf32>
    %41 = vector.shape_cast %40 : vector<1xf32> to vector<1x1x1xf32>
    %42 = vector.extract %41[0, 0, 0] : f32 from vector<1x1x1xf32>
    %43 = vector.broadcast %42 : f32 to vector<1x1xf32>
    %44 = arith.addf %38, %43 : vector<1x1xf32>
    %c0_17 = arith.constant 0 : index
    %c0_18 = arith.constant 0 : index
    %45 = vector.load %arg8[%c0_17, %c0_18] : memref<1x1xf32, #tpu.memory_space<vmem>>, vector<1x1xf32>
    tpu.vector_store %arg8[%c0_17, %c0_18], %44 {strides = array<i32>} : memref<1x1xf32, #tpu.memory_space<vmem>>, vector<1x1xf32>,
    %c1_i32_19 = arith.constant 1 : i32
    %46 = arith.cmpi eq, %arg0, %c1_i32_19 : i32
    %47 = arith.extui %46 : i1 to i32
    %c0_i32_20 = arith.constant 0 : i32
    %48 = arith.cmpi ne, %47, %c0_i32_20 : i32
    scf.if %48 {
      %c0_21 = arith.constant 0 : index
      %c0_22 = arith.constant 0 : index
      %49 = vector.load %arg8[%c0_21, %c0_22] : memref<1x1xf32, #tpu.memory_space<vmem>>, vector<1x1xf32>
      %50 = vector.shape_cast %49 : vector<1x1xf32> to vector<1x1x1xf32>
      %cst_23 = arith.constant dense<0.000000e+00> : vector<1xf32>
      %51 = vector.multi_reduction <add>, %50, %cst_23 [1, 2] : vector<1x1x1xf32> to vector<1xf32>
      %52 = vector.shape_cast %51 : vector<1xf32> to vector<1x1x1xf32>
      %53 = vector.extract %52[0, 0, 0] : f32 from vector<1x1x1xf32>
      %54 = arith.sitofp %13 : i32 to f32
      %55 = arith.divf %53, %54 : f32
      %c0_24 = arith.constant 0 : index
      %c0_25 = arith.constant 0 : index
      %56 = memref.load %arg5[%c0_24, %c0_25] : memref<1x1xf32, #tpu.memory_space<smem>>
      memref.store %55, %arg5[%c0_24, %c0_25] : memref<1x1xf32, #tpu.memory_space<smem>>
    } else {
    }
    return
  }
  func.func @transform_0(%arg0: i32, %arg1: memref<2xi32, #tpu.memory_space<smem>>, %arg2: memref<2x32xi32, #tpu.memory_space<smem>>) -> (i32, i32, i32) {
    %c0_i32 = arith.constant 0 : i32
    %c0_i32_0 = arith.constant 0 : i32
    %c0_i32_1 = arith.constant 0 : i32
    %c0_i32_2 = arith.constant 0 : i32
    return %c0_i32, %c0_i32_0, %c0_i32_1 : i32, i32, i32
  }
  func.func @transform_1(%arg0: i32, %arg1: memref<2xi32, #tpu.memory_space<smem>>, %arg2: memref<2x32xi32, #tpu.memory_space<smem>>) -> i32 {
    %c0_i32 = arith.constant 0 : i32
    %c0_i32_0 = arith.constant 0 : i32
    return %c0_i32 : i32
  }
  func.func @transform_2(%arg0: i32, %arg1: memref<2xi32, #tpu.memory_space<smem>>, %arg2: memref<2x32xi32, #tpu.memory_space<smem>>) -> (i32, i32) {
    %c0_i32 = arith.constant 0 : i32
    %c0_i32_0 = arith.constant 0 : i32
    %c0_i32_1 = arith.constant 0 : i32
    return %c0_i32, %c0_i32_0 : i32, i32
  }
}

</mosaic_0001>

<bundles_post_ra>
// kernel: tpu_custom_call.1
= control target key start
LH: loop header
LB: loop body
LE: loop exit
PB: predicated region body
PF: predicated region fallthrough
CT: control target
= control target key end

     0   :  { %s1470_s0 = inlined_call_operand.vmem [shape: s32[2], index: 0, kind: input, shape index: {}]   ;;  %s1471_s2 = inlined_call_operand.hbm [shape: f32[32,1,32], index: 2, kind: input, shape index: {}]   ;;  %s1472_s4 = inlined_call_operand.hbm [shape: f32[1,1], index: 4, kind: output, shape index: {}]   ;;  %s1473_s1 = inlined_call_operand.vmem [shape: s32[2,32], index: 1, kind: input, shape index: {}]   ;;  %s1474_s3 = inlined_call_operand.<no memory space> [shape: f32[1], index: 3, kind: input, shape index: {}]  }
   0x1   :  { %s9_s17 = sshll.u32 %s1470_s0, 4  ;;  %s13_s20 = sshll.u32 %s1473_s1, 4  ;;  %s10_s17 = int_to_ptr.vmem [resolvable:$true] %s9_s17  ;;  %s14_s20 = int_to_ptr.vmem [resolvable:$true] %s13_s20 }
   0x2   :  { %s934_s21 = scalar_lea.vmem %s10_s17, 16  ;;  %p939_p1 = scmp.lt.s32.totalorder %s10_s17, %s10_s17 }
   0x3   :  { %p935_p0 = scmp.ne.s32.totalorder %s10_s17, %s934_s21  ;;  %p940_p2 = scmp.lt.s32.totalorder %s934_s21, %s934_s21 }
   0x5   :  { %p941_p3 = por %p940_p2, %p939_p1 }
   0x7   :  { %p942_p4 = pnand %p941_p3, %p935_p0 }
   0x9   :  { %945 = shalt.err (!%p942_p4)  }
   0xa   :  { %s1020_s22 = smov [#allocation6]   ;;  %s946_s23 = scalar_lea.vmem %s14_s20, 32 }
   0xb   :  { %12 = dma.vmem_to_smem %s10_s17, 16, %s1020_s22, [#allocation5] }
   0xc   :  { %p947_p5 = scmp.ne.s32.totalorder %s14_s20, %s946_s23  ;;  %p951_p6 = scmp.lt.s32.totalorder %s14_s20, %s14_s20 }
   0xd   :  { %p952_p7 = scmp.lt.s32.totalorder %s946_s23, %s946_s23 }
   0xf   :  { %p953_p8 = por %p952_p7, %p951_p6 }
  0x11   :  { %p954_p9 = pnand %p953_p8, %p947_p5 }
  0x13   :  { %957 = shalt.err (!%p954_p9)  }
  0x14   :  { %s1021_s0 = smov [#allocation7]   ;;  %17 = sst [smem:[#allocation8]] %s1474_s3 }
  0x15   :  { %16 = dma.vmem_to_smem %s14_s20, 32, %s1021_s0, [#allocation5] }
  0x16   :  { %1002 = dma.done.wait [#allocation5], 48 }
  0x17   :  { %1003 = vsyncadd [#allocation5], 4294967248 }
  0x18   :  { %19 = sfence }
  0x19   :  { %20 = vsyncpa [#allocation10], 0 }
  0x1a   :  { %21 = vsyncpa [#allocation11], 0  ;;  %s1062_s25 = smov 0  }
  0x1b LB: > { %s1068_s26 = sadd.s32 4294967295, %s1014_s25   ;;  %p803_p10 = scmp.ge.s32.totalorder %s1014_s25, 1  ;;  %s1014_s25 = sphi %s1062_s25, %s27_s25  }
  0x1c   : > { %p95_p11 = scmp.lt.s32.totalorder %s1014_s25, 3  ;;  %s1022_s3 = smov [#allocation9]  }
  0x1d   : > { %s107_s27 = sshll.u32 %s1022_s3, 4  ;;  %p840_p0 = scmp.eq.s32.totalorder %s1068_s26, 0  ;;  %s108_s27 = int_to_ptr.vmem [resolvable:$true] %s107_s27 }
  0x1e   : > { %p1073_p13 = pnand %p803_p10, %p95_p11  ;;  %s969_s29 = scalar_lea.vmem %s108_s27, 512 }
  0x1f   : > { %p970_p4 = scmp.ne.s32.totalorder %s108_s27, %s969_s29  ;;  %p977_p7 = scmp.lt.s32.totalorder %s108_s27, %s108_s27 }
  0x20   : > { %p836_p1 = pneg %p1073_p13  ;;  %p978_p8 = scmp.lt.s32.totalorder %s969_s29, %s969_s29 }
  0x22   : > { %p837_p2 = pnand %p840_p0, %p836_p1  ;;  %p979_p9 = por %p978_p8, %p977_p7 }
  0x24   : > { %p960_p3 = pneg %p837_p2 }
  0x26   : > { %p972_p5 = pnand %p970_p4, %p960_p3 }
  0x28   : > { %p973_p6 = pneg %p972_p5 }
  0x2a   : > { %p980_p12 = pnand %p979_p9, %p973_p6 }
  0x2c   : > { %983 = shalt.err (!%p980_p12)
}
  0x2d   : > { %s1023_s30 = smov 16   ;;  %s1024_s5 = smov 1  }
  0x2e   : > { %839 = dma.hbm_to_vmem [thread:$0]  (!%p837_p2), %s1471_s2, 512, %s108_s27, [#allocation10], %s1023_s30, %s1023_s30, %s1024_s5  }
  0x2f   : > { %126 = sbr.rel (%p1073_p13) target bundleno = 587 (0x24b), region = 28 }
  0x34   : > { %1005 = dma.done.wait (%p840_p0), [#allocation10], 512  }
  0x35   : > { %1007 = vsyncadd (%p840_p0), [#allocation10], 4294966784  ;;  %p1476_p10 = scmp.ne.s32.totalorder %s1068_s26, 0 }
  0x37   : > { %141 = sbr.rel (%p1476_p10) target bundleno = 62 (0x3e), region = 36 }
  0x3c   : > { %vm142_vm0 = vcmask 0   ;;  %v1025_v0 = vmov 0.0  }
  0x3d   : > { %143 = vst.msk [vmem:[#allocation4] sm:$0x1] %vm142_vm0, %v1025_v0 }
  0x3e PF: > { %s808_s8 = sshll.u32 %s1068_s26, 4  ;;  %s1016_s9 = smov 0  }
  0x3f LB: >> { %s151_s10 = sadd.s32 %s1018_s9, %s808_s8  ;;  %vm164_vm1 = vcmask 253952   ;;  %s163_s19 = scalar_lea.vmem [#allocation2], %s1018_s9  ;;  %s1018_s9 = sphi %s1016_s9, %s150_s9  }
  0x40   : >> { %s152_s11 = sld [smem:[#allocation7 + %s151_s10]]  ;;  %s153_s12 = sshra.s32 %s151_s10, 7 }
  0x41   : >> { %s820_s13 = sshll.u32 %s153_s12, 7  ;;  %s158_s14 = sand.u32 127, %s151_s10 }
  0x42   : >> { %s821_s15 = sadd.s32 128, %s820_s13  ;;  %s168_s21 = scalar_lea.vmem [#allocation3], %s1018_s9 }
  0x43   : >> { %s159_s16 = sadd.s32 %s821_s15, %s158_s14  ;;  %s150_s9 = sadd.s32 1, %s1018_s9  }
  0x44   : >> { %s160_s17 = sld [smem:[#allocation7 + %s159_s16]]  ;;  %p147_p11 = scmp.ge.s32.totalorder %s150_s9, 16  }
  0x45   : > { %s202_s22 = sld [smem:[#allocation8]] (%p147_p11)  ;;  %vm681_vm6 = vcmask (%p147_p11), 1041409   ;;  %vm684_vm7 = vcmask (%p147_p11), 1042434   ;;  %vm690_vm8 = vcmask (%p147_p11), 1044484   ;;  %vm687_vm9 = vcmask (%p147_p11), 1043459   ;;  %p815_p12 = scmp.ne.s32.totalorder (%p147_p11), %s1068_s26, 1 }
  0x46   : >> { %s161_s18 = scalar_lea.vmem [#allocation9], %s152_s11  ;;  %s1123_s23 = sld [smem:[#allocation6]] (%p147_p11)  ;;  %vm693_vm10 = vcmask (%p147_p11), 1045509   ;;  %vm696_vm11 = vcmask (%p147_p11), 1046534   ;;  %vm699_vm12 = vcmask (%p147_p11), 1047559   ;;  %vm717_vm13 = vcmask (%p147_p11), 7168  }
  0x47   : >> { %v162_v1 = vld [vmem:[%s161_s18] sm:$0x1]  ;;  %s1135_s0 = sld [smem:[#allocation6 + $0x1]] (%p147_p11)  ;;  %vm732_vm14 = vcmask (%p147_p11), 0  }
  0x48   : >> { %165 = vst.msk [vmem:[%s163_s19] sm:$0x1] %vm164_vm1, %v162_v1  ;;  %149 = sbr.rel (!%p147_p11) target bundleno = 63 (0x3f), region = 77 }
  0x4a   : >> { %s166_s20 = scalar_lea.vmem [#allocation9], %s160_s17 }
  0x4b   : >> { %v167_v2 = vld [vmem:[%s166_s20] sm:$0x1] }
  0x4c   : >> { %169 = vst.msk [vmem:[%s168_s21] sm:$0x1] %vm164_vm1, %v167_v2 }
  0x4d   : > { %s741_s24 = scvt.s32.f32 (!%p815_p12), %s1135_s0 }
  0x4f   : > { %v172_v3 = vld [vmem:[#allocation2 + $0x2] sm:$0x1]  ;;  %v171_v5 = vld [vmem:[#allocation2 + $0x1] sm:$0x1]  ;;  %v180_v8 = vld [vmem:[#allocation2 + $0xa] sm:$0x1] }
  0x50   : > { %v179_v12 = vld [vmem:[#allocation2 + $0x9] sm:$0x1]  ;;  %v173_v14 = vld [vmem:[#allocation2 + $0x3] sm:$0x1]  ;;  %v170_v18 = vld [vmem:[#allocation2] sm:$0x1] }
  0x51   : > { %v181_v25 = vld [vmem:[#allocation2 + $0xb] sm:$0x1]  ;;  %v178_v27 = vld [vmem:[#allocation2 + $0x8] sm:$0x1]  ;;  %v182_v33 = vld [vmem:[#allocation2 + $0xc] sm:$0x1] }
  0x52   : > { %v174_v35 = vld [vmem:[#allocation2 + $0x4] sm:$0x1]  ;;  %v183_v41 = vld [vmem:[#allocation2 + $0xd] sm:$0x1]  ;;  %v175_v43 = vld [vmem:[#allocation2 + $0x5] sm:$0x1] }
  0x53   : > { %v188_v4 = vld [vmem:[#allocation3 + $0x2] sm:$0x1]  ;;  %v187_v7 = vld [vmem:[#allocation3 + $0x1] sm:$0x1]  ;;  %v196_v9 = vld [vmem:[#allocation3 + $0xa] sm:$0x1] }
  0x54   : > { %v205_v6 = vmul.f32 %v188_v4, %v172_v3  ;;  %v204_v10 = vmul.f32 %v187_v7, %v171_v5  ;;  %v213_v11 = vmul.f32 %v196_v9, %v180_v8  ;;  %v195_v13 = vld [vmem:[#allocation3 + $0x9] sm:$0x1]  ;;  %v189_v17 = vld [vmem:[#allocation3 + $0x3] sm:$0x1]  ;;  %v186_v20 = vld [vmem:[#allocation3] sm:$0x1]  ;;  %v1114_v3 = vstv %s202_s22 }
  0x55   : > { %v212_v16 = vmul.f32 %v195_v13, %v179_v12  ;;  %v206_v22 = vmul.f32 %v189_v17, %v173_v14  ;;  %v203_v24 = vmul.f32 %v186_v20, %v170_v18  ;;  %v197_v26 = vld [vmem:[#allocation3 + $0xb] sm:$0x1]  ;;  %v194_v28 = vld [vmem:[#allocation3 + $0x8] sm:$0x1]  ;;  %v198_v34 = vld [vmem:[#allocation3 + $0xc] sm:$0x1]  ;;  %v287_v7 = vlaneseq }
  0x56   : > { %v226_v15 = vsel %vm164_vm1, %v205_v6, 0.0  ;;  %v223_v19 = vsel %vm164_vm1, %v204_v10, 0.0  ;;  %v250_v21 = vsel %vm164_vm1, %v213_v11, 0.0  ;;  %v214_v30 = vmul.f32 %v197_v26, %v181_v25  ;;  %v190_v36 = vld [vmem:[#allocation3 + $0x4] sm:$0x1] }
  0x57   : > { %227 = vadd.xlane.f32.xlu1 %v226_v15  ;;  %224 = vadd.xlane.f32.xlu0 %v223_v19  ;;  %v247_v23 = vsel %vm164_vm1, %v212_v16, 0.0  ;;  %v229_v29 = vsel %vm164_vm1, %v206_v22, 0.0  ;;  %v220_v31 = vsel %vm164_vm1, %v203_v24, 0.0  ;;  %v211_v32 = vmul.f32 %v194_v28, %v178_v27  ;;  %v199_v42 = vld [vmem:[#allocation3 + $0xd] sm:$0x1] }
  0x58   : > { %v253_v37 = vsel %vm164_vm1, %v214_v30, 0.0  ;;  %v215_v38 = vmul.f32 %v198_v34, %v182_v33  ;;  %v207_v40 = vmul.f32 %v190_v36, %v174_v35  ;;  %v191_v44 = vld [vmem:[#allocation3 + $0x5] sm:$0x1]  ;;  %v216_v46 = vmul.f32 %v199_v42, %v183_v41  ;;  %v184_v49 = vld [vmem:[#allocation2 + $0xe] sm:$0x1] }
  0x59   : > { %v244_v39 = vsel %vm164_vm1, %v211_v32, 0.0  ;;  %v208_v48 = vmul.f32 %v191_v44, %v175_v43  ;;  %v200_v50 = vld [vmem:[#allocation3 + $0xe] sm:$0x1]  ;;  %v176_v51 = vld [vmem:[#allocation2 + $0x6] sm:$0x1]  ;;  %v1129_v15 = vshrl.u32 %v287_v7, 7  ;;  %v293_v33 = vstv %s1123_s23 }
  0x5a   : > { %v256_v45 = vsel %vm164_vm1, %v215_v38, 0.0  ;;  %v232_v47 = vsel %vm164_vm1, %v207_v40, 0.0  ;;  %v192_v52 = vld [vmem:[#allocation3 + $0x6] sm:$0x1]  ;;  %v259_v53 = vsel %vm164_vm1, %v216_v46, 0.0  ;;  %v217_v54 = vmul.f32 %v200_v50, %v184_v49 }
  0x5b   : > { %251 = vadd.xlane.f32.xlu1 %v250_v21  ;;  %248 = vadd.xlane.f32.xlu0 %v247_v23  ;;  %v235_v55 = vsel %vm164_vm1, %v208_v48, 0.0  ;;  %v209_v56 = vmul.f32 %v192_v52, %v176_v51  ;;  %v185_v57 = vld [vmem:[#allocation2 + $0xf] sm:$0x1]  ;;  %v201_v58 = vld [vmem:[#allocation3 + $0xf] sm:$0x1]  ;;  %v289_v18 = vadd.s32 8, %v1129_v15  ;;  %v290_v21 = vstv %s808_s8 }
  0x5c   : > { %v177_v59 = vld [vmem:[#allocation2 + $0x7] sm:$0x1]  ;;  %v193_v60 = vld [vmem:[#allocation3 + $0x7] sm:$0x1]  ;;  %v262_v61 = vsel %vm164_vm1, %v217_v54, 0.0  ;;  %v218_v62 = vmul.f32 %v201_v58, %v185_v57  ;;  %v1160_v41 = vsub.s32 2, %v1129_v15 }
  0x5d   : > { %v238_v63 = vsel %vm164_vm1, %v209_v56, 0.0  ;;  %v210_v0 = vmul.f32 %v193_v60, %v177_v59  ;;  %v1148_v30 = vadd.s32 %v290_v21, %v289_v18  ;;  %v1181_v56 = vsub.s32 1, %v1129_v15 }
  0x5e   : > { %v265_v1 = vsel %vm164_vm1, %v218_v62, 0.0  ;;  %v1026_v59 = vmov 0.0  }
  0x5f   : > { %230 = vadd.xlane.f32.xlu1 %v229_v29  ;;  %221 = vadd.xlane.f32.xlu0 %v220_v31  ;;  %v241_v2 = vsel %vm164_vm1, %v210_v0, 0.0  ;;  %v291_v29 = vadd.s32 %v290_v21, %v1129_v15  ;;  %vm1170_vm3 = vcmp.lt.s32.totalorder %v1148_v30, %v293_v33 }
  0x60   : > { %v1195_v0 = vsel %vm1170_vm3, 1.0, %v1026_v59 }
  0x61   : > { %vm1163_vm2 = vcmp.lt.s32.totalorder %v291_v29, %v293_v33 }
  0x62   : > { %v1187_v60 = vsel %vm1163_vm2, 1.0, %v1026_v59 }
  0x63   : > { %254 = vadd.xlane.f32.xlu1 %v253_v37  ;;  %245 = vadd.xlane.f32.xlu0 %v244_v39  ;;  %v332_v21 = vrot.slane %v1187_v60, %v1181_v56 }
  0x67   : > { %257 = vadd.xlane.f32.xlu1 %v256_v45  ;;  %233 = vadd.xlane.f32.xlu0 %v232_v47  ;;  %v300_v45 = vstv %s1135_s0 }
  0x68   : > { %vm301_vm4 = vcmp.lt.s32.totalorder %v291_v29, %v300_v45  ;;  %vm302_vm5 = vcmp.lt.s32.totalorder %v1148_v30, %v300_v45 }
  0x69   : > { %v1275_v30 = vsel %vm302_vm5, 1.0, %v1026_v59 }
  0x6b   : > { %260 = vadd.xlane.f32.xlu1 %v259_v53  ;;  %236 = vadd.xlane.f32.xlu0 %v235_v55 }
  0x6f   : > { %263 = vadd.xlane.f32.xlu1 %v262_v61  ;;  %239 = vadd.xlane.f32.xlu0 %v238_v63 }
  0x73   : > { %266 = vadd.xlane.f32.xlu1 %v265_v1  ;;  %242 = vadd.xlane.f32.xlu0 %v241_v2 }
  0xe0   : > { %v228_v4 = vpop.xlane.xlu1 %227  ;;  %v225_v6 = vpop.xlane.xlu0 %224 }
  0xe1   : > { %v1117_v5 = vmul.f32 %v1114_v3, %v228_v4  ;;  %v1120_v8 = vmul.f32 %v1114_v3, %v225_v6 }
  0xe3   : > { %v439_v9 = vand.u32 2147483647, %v1117_v5  ;;  %v438_v12 = vand.u32 2147483647, %v1120_v8 }
  0xe4   : > { %v252_v10 = vpop.xlane.xlu1 %251  ;;  %v249_v14 = vpop.xlane.xlu0 %248 }
  0xe5   : > { %v455_v11 = vsub.f32 0.0, %v439_v9  ;;  %v1127_v13 = vmul.f32 %v1114_v3, %v252_v10  ;;  %v1132_v16 = vmul.f32 %v1114_v3, %v249_v14  ;;  %v454_v23 = vsub.f32 0.0, %v438_v12 }
  0xe6   : > { %v1204_v10 = vsub.s32 3, %v1129_v15  ;;  %v1210_v14 = vsel %vm301_vm4, 1.0, %v1026_v59 }
  0xe7   : > { %v447_v17 = vand.u32 2147483647, %v1127_v13  ;;  %v446_v19 = vand.u32 2147483647, %v1132_v16  ;;  %v473_v22 = vmul.f32 1.442695, %v455_v11 }
  0xe8   : > { %v231_v20 = vpop.xlane.xlu1 %230  ;;  %v222_v24 = vpop.xlane.xlu0 %221  ;;  %v471_v34 = vmul.f32 1.442695, %v454_v23  ;;  %v1207_v11 = vsub.s32 0, %v1129_v15  ;;  %v1220_v23 = vsub.s32 4, %v1129_v15 }
  0xe9   : > { %v463_v25 = vsub.f32 0.0, %v447_v17  ;;  %v1142_v26 = vmul.f32 %v1114_v3, %v231_v20  ;;  %v1145_v27 = vmul.f32 %v1114_v3, %v222_v24  ;;  %v462_v28 = vsub.f32 0.0, %v446_v19 }
  0xea   : > { %868 = vpow2.f32 %v473_v22  ;;  %v336_v17 = vrot.slane %v1187_v60, %v1160_v41  ;;  %v368_v22 = vrot.slane %v1195_v0, %v1160_v41  ;;  %v360_v49 = vrot.slane %v1195_v0, %v1207_v11 }
  0xeb   : > { %v437_v31 = vand.u32 2147483647, %v1145_v27  ;;  %v489_v37 = vmul.f32 1.442695, %v463_v25  ;;  %v440_v38 = vand.u32 2147483647, %v1142_v26  ;;  %870 = vpow2.f32 %v471_v34 }
  0xec   : > { %v255_v32 = vpop.xlane.xlu1 %254  ;;  %v246_v36 = vpop.xlane.xlu0 %245  ;;  %v487_v42 = vmul.f32 1.442695, %v462_v28  ;;  %v364_v34 = vrot.slane %v1195_v0, %v1181_v56  ;;  %v415_v33 = vmul.f32 %v368_v22, %v1127_v13 }
  0xed   : > { %v1153_v35 = vmul.f32 %v1114_v3, %v255_v32  ;;  %v453_v39 = vsub.f32 0.0, %v437_v31  ;;  %v1157_v40 = vmul.f32 %v1114_v3, %v246_v36  ;;  %872 = vpow2.f32 %v489_v37 }
  0xee   : > { %v456_v53 = vsub.f32 0.0, %v440_v38  ;;  %874 = vpow2.f32 %v487_v42  ;;  %v340_v37 = vrot.slane %v1187_v60, %v1204_v10  ;;  %v1236_v38 = vsub.s32 5, %v1129_v15 }
  0xef   : > { %v448_v43 = vand.u32 2147483647, %v1153_v35  ;;  %v469_v46 = vmul.f32 1.442695, %v453_v39  ;;  %v445_v47 = vand.u32 2147483647, %v1157_v40  ;;  %v328_v42 = vrot.slane %v1187_v60, %v1207_v11 }
  0xf0   : > { %v258_v48 = vpop.xlane.xlu1 %257  ;;  %v234_v52 = vpop.xlane.xlu0 %233  ;;  %v475_v6 = vmul.f32 1.442695, %v456_v53 }
  0xf1   : > { %v464_v50 = vsub.f32 0.0, %v448_v43  ;;  %v1175_v51 = vmul.f32 %v1114_v3, %v258_v48  ;;  %v461_v54 = vsub.f32 0.0, %v445_v47  ;;  %v1178_v55 = vmul.f32 %v1114_v3, %v234_v52 }
  0xf2   : > { %876 = vpow2.f32 %v469_v46  ;;  %v372_v43 = vrot.slane %v1195_v0, %v1204_v10 }
  0xf3   : > { %v491_v57 = vmul.f32 1.442695, %v464_v50  ;;  %v449_v58 = vand.u32 2147483647, %v1175_v51  ;;  %v485_v61 = vmul.f32 1.442695, %v461_v54  ;;  %v376_v50 = vrot.slane %v1195_v0, %v1220_v23 }
  0xf4   : > { %v441_v62 = vand.u32 2147483647, %v1178_v55  ;;  %v261_v63 = vpop.xlane.xlu1 %260  ;;  %v237_v4 = vpop.xlane.xlu0 %236 }
  0xf5   : > { %v465_v1 = vsub.f32 0.0, %v449_v58  ;;  %v1198_v2 = vmul.f32 %v1114_v3, %v261_v63  ;;  %878 = vpow2.f32 %v485_v61  ;;  %v1201_v9 = vmul.f32 %v1114_v3, %v237_v4 }
  0xf6   : > { %v457_v7 = vsub.f32 0.0, %v441_v62  ;;  %880 = vpow2.f32 %v491_v57  ;;  %v344_v58 = vrot.slane %v1187_v60, %v1220_v23  ;;  %v1251_v61 = vsub.s32 6, %v1129_v15 }
  0xf7   : > { %v493_v12 = vmul.f32 1.442695, %v465_v1  ;;  %v450_v19 = vand.u32 2147483647, %v1198_v2  ;;  %v442_v24 = vand.u32 2147483647, %v1201_v9  ;;  %v869_v28 = vpop.eup %868  ;;  %882 = vpow2.f32 %v475_v6 }
  0xf8   : > { %v477_v18 = vmul.f32 1.442695, %v457_v7  ;;  %v264_v20 = vpop.xlane.xlu1 %263  ;;  %v240_v25 = vpop.xlane.xlu0 %239  ;;  %v503_v48 = vadd.f32 1.0, %v869_v28  ;;  %v380_v1 = vrot.slane %v1195_v0, %v1236_v38  ;;  %v1256_v6 = vsub.s32 7, %v1129_v15 }
  0xf9   : > { %v466_v29 = vsub.f32 0.0, %v450_v19  ;;  %v1224_v31 = vmul.f32 %v1114_v3, %v264_v20  ;;  %v1227_v32 = vmul.f32 %v1114_v3, %v240_v25  ;;  %884 = vpow2.f32 %v493_v12  ;;  %v871_v47 = vpop.eup %870 }
  0xfa   : > { %v458_v36 = vsub.f32 0.0, %v442_v24  ;;  %886 = vpow2.f32 %v477_v18  ;;  %v873_v57 = vpop.eup %872  ;;  %v502_v12 = vadd.f32 1.0, %v871_v47  ;;  %v348_v15 = vrot.slane %v1187_v60, %v1236_v38 }
  0xfb   : > { %v495_v39 = vmul.f32 1.442695, %v466_v29  ;;  %v451_v46 = vand.u32 2147483647, %v1224_v31  ;;  %v443_v52 = vand.u32 2147483647, %v1227_v32  ;;  %v875_v63 = vpop.eup %874 }
  0xfc   : > { %v479_v44 = vmul.f32 1.442695, %v458_v36  ;;  %v267_v53 = vpop.xlane.xlu1 %266  ;;  %v243_v54 = vpop.xlane.xlu0 %242  ;;  %v511_v24 = vadd.f32 1.0, %v873_v57  ;;  %v510_v29 = vadd.f32 1.0, %v875_v63  ;;  %v384_v36 = vrot.slane %v1195_v0, %v1251_v61 }
  0xfd   : > { %888 = vpow2.f32 %v495_v39  ;;  %v467_v62 = vsub.f32 0.0, %v451_v46  ;;  %v459_v4 = vsub.f32 0.0, %v443_v52  ;;  %v1259_v19 = vmul.f32 %v1114_v3, %v267_v53 }
  0xfe   : > { %890 = vpow2.f32 %v479_v44  ;;  %v1262_v20 = vmul.f32 %v1114_v3, %v243_v54  ;;  %v352_v3 = vrot.slane %v1187_v60, %v1251_v61  ;;  %v574_v57 = vrot.slane %v1210_v14, %v1181_v56 }
  0xff   : > { %v877_v7 = vpop.eup %876  ;;  %v497_v18 = vmul.f32 1.442695, %v467_v62  ;;  %892 = vlog2.f32 %v503_v48  ;;  %v481_v25 = vmul.f32 1.442695, %v459_v4  ;;  %v452_v46 = vand.u32 2147483647, %v1259_v19 }
 0x100   : > { %v501_v44 = vadd.f32 1.0, %v877_v7  ;;  %v444_v47 = vand.u32 2147483647, %v1262_v20  ;;  %v388_v48 = vrot.slane %v1195_v0, %v1256_v6  ;;  %v606_v7 = vrot.slane %v1275_v30, %v1181_v56 }
 0x101   : > { %894 = vpow2.f32 %v497_v18  ;;  %v468_v52 = vsub.f32 0.0, %v452_v46  ;;  %v1483_v56 = vrot.slane %v1210_v14, %v1207_v11 }
 0x102   : > { %v879_v28 = vpop.eup %878  ;;  %896 = vpow2.f32 %v481_v25  ;;  %v460_v63 = vsub.f32 0.0, %v444_v47 }
 0x103   : > { %v881_v39 = vpop.eup %880  ;;  %898 = vlog2.f32 %v502_v12  ;;  %v509_v45 = vadd.f32 1.0, %v879_v28  ;;  %v499_v12 = vmul.f32 1.442695, %v468_v52 }
 0x104   : > { %900 = vlog2.f32 %v511_v24  ;;  %v883_v54 = vpop.eup %882  ;;  %v512_v62 = vadd.f32 1.0, %v881_v39  ;;  %v483_v28 = vmul.f32 1.442695, %v460_v63 }
 0x105   : > { %902 = vlog2.f32 %v510_v29  ;;  %v504_v46 = vadd.f32 1.0, %v883_v54 }
 0x106   : > { %v885_v59 = vpop.eup %884  ;;  %904 = vlog2.f32 %v501_v44  ;;  %v602_v44 = vrot.slane %v1275_v30, %v1207_v11  ;;  %v1487_v11 = vrot.slane %v1275_v30, %v1236_v38 }
 0x107   : > { %v887_v18 = vpop.eup %886  ;;  %906 = vlog2.f32 %v509_v45  ;;  %v513_v25 = vadd.f32 1.0, %v885_v59  ;;  %v405_v59 = vmul.f32 %v328_v42, %v1145_v27 }
 0x108   : > { %908 = vpow2.f32 %v499_v12  ;;  %v505_v54 = vadd.f32 1.0, %v887_v18  ;;  %v308_v18 = vmax.f32 %v1120_v8, 0.0 }
 0x109   : > { %910 = vlog2.f32 %v512_v62  ;;  %v309_v62 = vmax.f32 %v1117_v5, 0.0 }
 0x10a   : > { %v889_v52 = vpop.eup %888  ;;  %912 = vlog2.f32 %v513_v25  ;;  %v407_v25 = vmul.f32 %v336_v17, %v1117_v5  ;;  %v316_v17 = vmax.f32 %v1132_v16, 0.0 }
 0x10b   : > { %v891_v12 = vpop.eup %890  ;;  %v514_v24 = vadd.f32 1.0, %v889_v52  ;;  %914 = vpow2.f32 %v483_v28  ;;  %v406_v52 = vmul.f32 %v332_v21, %v1120_v8  ;;  %v317_v28 = vmax.f32 %v1127_v13, 0.0 }
 0x10c   : > { %916 = vlog2.f32 %v504_v46  ;;  %v506_v45 = vadd.f32 1.0, %v891_v12  ;;  %v1312_v63 = vpop.eup %892  ;;  %v414_v46 = vmul.f32 %v364_v34, %v1132_v16  ;;  %v310_v12 = vmax.f32 %v1142_v26, 0.0 }
 0x10d   : > { %918 = vlog2.f32 %v514_v24  ;;  %v408_v21 = vmul.f32 %v340_v37, %v1142_v26  ;;  %v307_v13 = vmax.f32 %v1145_v27, 0.0  ;;  %v318_v16 = vmax.f32 %v1153_v35, 0.0 }
 0x10e   : > { %v895_v5 = vpop.eup %894  ;;  %920 = vlog2.f32 %v505_v54  ;;  %v416_v34 = vmul.f32 %v372_v43, %v1153_v35  ;;  %v1349_v42 = vsub.f32 %v309_v62, %v407_v25  ;;  %v431_v47 = vsub.f32 %v317_v28, %v415_v33 }
 0x10f   : > { %v897_v8 = vpop.eup %896  ;;  %922 = vlog2.f32 %v506_v45  ;;  %v515_v22 = vadd.f32 1.0, %v895_v5  ;;  %v422_v5 = vsub.f32 %v308_v18, %v406_v52  ;;  %v315_v35 = vmax.f32 %v1157_v40, 0.0 }
 0x110   : > { %v899_v24 = vpop.eup %898  ;;  %v507_v54 = vadd.f32 1.0, %v897_v8  ;;  %v413_v43 = vmul.f32 %v360_v49, %v1157_v40  ;;  %v319_v8 = vmax.f32 %v1175_v51, 0.0  ;;  %v430_v25 = vsub.f32 %v316_v17, %v414_v46 }
 0x111   : > { %v901_v53 = vpop.eup %900  ;;  %924 = vlog2.f32 %v515_v22  ;;  %v417_v22 = vmul.f32 %v376_v50, %v1175_v51  ;;  %v1361_v18 = vsub.f32 %v310_v12, %v408_v21  ;;  %v421_v33 = vsub.f32 %v307_v13, %v405_v59 }
 0x112   : > { %v903_v27 = vpop.eup %902  ;;  %926 = vlog2.f32 %v507_v54  ;;  %v432_v52 = vsub.f32 %v318_v16, %v416_v34  ;;  %v311_v54 = vmax.f32 %v1178_v55, 0.0  ;;  %v409_v40 = vmul.f32 %v344_v58, %v1178_v55 }
 0x113   : > { %v905_v29 = vpop.eup %904  ;;  %v320_v49 = vmax.f32 %v1198_v2, 0.0  ;;  %v418_v51 = vmul.f32 %v380_v1, %v1198_v2  ;;  %v536_v17 = vmul.f32 0.6931472, %v903_v27  ;;  %v312_v59 = vmax.f32 %v1201_v9, 0.0 }
 0x114   : > { %v907_v62 = vpop.eup %906  ;;  %v410_v46 = vmul.f32 %v348_v15, %v1201_v9  ;;  %v429_v13 = vsub.f32 %v315_v35, %v413_v43  ;;  %v433_v55 = vsub.f32 %v319_v8, %v417_v22  ;;  %v321_v58 = vmax.f32 %v1224_v31, 0.0 }
 0x115   : > { %v909_v28 = vpop.eup %908  ;;  %v419_v2 = vmul.f32 %v384_v36, %v1224_v31  ;;  %v534_v16 = vmul.f32 0.6931472, %v907_v62  ;;  %v313_v34 = vmax.f32 %v1227_v32, 0.0  ;;  %v411_v9 = vmul.f32 %v352_v3, %v1227_v32 }
 0x116   : > { %v911_v50 = vpop.eup %910  ;;  %v516_v12 = vadd.f32 1.0, %v909_v28  ;;  %v520_v27 = vmul.f32 0.6931472, %v899_v24  ;;  %v538_v35 = vmul.f32 0.6931472, %v901_v53  ;;  %v425_v43 = vsub.f32 %v311_v54, %v409_v40 }
 0x117   : > { %v913_v21 = vpop.eup %912  ;;  %v558_v28 = vadd.f32 %v536_v17, %v430_v25  ;;  %v540_v26 = vmul.f32 0.6931472, %v911_v50  ;;  %v434_v45 = vsub.f32 %v320_v49, %v418_v51  ;;  %v426_v31 = vsub.f32 %v312_v59, %v410_v46 }
 0x118   : > { %v915_v1 = vpop.eup %914  ;;  %928 = vlog2.f32 %v516_v12  ;;  %v518_v62 = vmul.f32 0.6931472, %v905_v29  ;;  %v542_v37 = vmul.f32 0.6931472, %v913_v21  ;;  %v435_v39 = vsub.f32 %v321_v58, %v419_v2 }
 0x119   : > { %v917_v15 = vpop.eup %916  ;;  %v508_v8 = vadd.f32 1.0, %v915_v1  ;;  %v522_v32 = vmul.f32 0.6931472, %v1312_v63  ;;  %v557_v3 = vadd.f32 %v534_v16, %v429_v13  ;;  %v427_v24 = vsub.f32 %v313_v34, %v411_v9 }
 0x11a   : > { %v919_v22 = vpop.eup %918  ;;  %v550_v53 = vadd.f32 %v520_v27, %v422_v5  ;;  %v559_v54 = vadd.f32 %v538_v35, %v431_v47  ;;  %v524_v40 = vmul.f32 0.6931472, %v917_v15  ;;  %v322_v25 = vmax.f32 %v1259_v19, 0.0 }
 0x11b   : > { %v921_v36 = vpop.eup %920  ;;  %930 = vlog2.f32 %v508_v8  ;;  %v544_v12 = vmul.f32 0.6931472, %v919_v22  ;;  %v656_v49 = vmul.f32 %v606_v7, %v558_v28  ;;  %v560_v29 = vadd.f32 %v540_v26, %v432_v52 }
 0x11c   : > { %v923_v4 = vpop.eup %922  ;;  %v526_v51 = vmul.f32 0.6931472, %v921_v36  ;;  %v420_v63 = vmul.f32 %v388_v48, %v1259_v19  ;;  %v549_v59 = vadd.f32 %v518_v62, %v421_v33  ;;  %v561_v5 = vadd.f32 %v542_v37, %v433_v55 }
 0x11d   : > { %v528_v47 = vmul.f32 0.6931472, %v923_v4  ;;  %v551_v21 = vadd.f32 %v522_v32, %v1349_v42  ;;  %v655_v13 = vmul.f32 %v602_v44, %v557_v3  ;;  %v562_v7 = vadd.f32 %v544_v12, %v434_v45 }
 0x11e   : > { %v925_v50 = vpop.eup %924  ;;  %v648_v0 = vmul.f32 %v574_v57, %v550_v53  ;;  %v1481_v19 = vrot.slane %v1275_v30, %v1160_v41  ;;  %v552_v4 = vadd.f32 %v524_v40, %v1361_v18  ;;  %v701_v42 = vrot.slane %v656_v49, 7 }
 0x11f   : > { %v927_v17 = vpop.eup %926  ;;  %v546_v46 = vmul.f32 0.6931472, %v925_v50  ;;  %v1482_v44 = vrot.slane %v1275_v30, %v1204_v10  ;;  %v553_v33 = vadd.f32 %v526_v51, %v425_v43  ;;  %v314_v52 = vmax.f32 %v1262_v20, 0.0 }
 0x120   : > { %v530_v26 = vmul.f32 0.6931472, %v927_v17  ;;  %v657_v48 = vmul.f32 %v1481_v19, %v559_v54  ;;  %v647_v57 = vmul.f32 %v1483_v56, %v549_v59  ;;  %v1484_v55 = vrot.slane %v1275_v30, %v1220_v23 }
 0x121   : > { %v563_v37 = vadd.f32 %v546_v46, %v435_v39  ;;  %v658_v45 = vmul.f32 %v1482_v44, %v560_v29  ;;  %v554_v39 = vadd.f32 %v528_v47, %v426_v31  ;;  %v1485_v58 = vrot.slane %v1187_v60, %v1256_v6 }
 0x122   : > { %v659_v18 = vmul.f32 %v1484_v55, %v561_v5  ;;  %v1486_v1 = vrot.slane %v1210_v14, %v1160_v41  ;;  %v702_v34 = vsel %vm681_vm6, %v701_v42, %v655_v13  ;;  %v660_v9 = vmul.f32 %v1487_v11, %v562_v7 }
 0x123   : > { %v412_v2 = vmul.f32 %v1485_v58, %v1262_v20  ;;  %v555_v15 = vadd.f32 %v530_v26, %v427_v24  ;;  %v680_v35 = vrot.slane %v648_v0, 7  ;;  %v703_v43 = vrot.slane %v657_v48, 6 }
 0x124   : > { %v649_v16 = vmul.f32 %v1486_v1, %v551_v21  ;;  %v1488_v8 = vrot.slane %v1210_v14, %v1204_v10  ;;  %v1489_v60 = vrot.slane %v1275_v30, %v1251_v61  ;;  %v705_v41 = vrot.slane %v658_v45, 5  ;;  %v663_v1 = vld [vmem:[#allocation4] sm:$0x1] }
 0x125   : > { %v929_v27 = vpop.eup %928  ;;  %v1490_v28 = vrot.slane %v1210_v14, %v1220_v23  ;;  %v436_v36 = vsub.f32 %v322_v25, %v420_v63  ;;  %v682_v32 = vsel %vm681_vm6, %v680_v35, %v647_v57  ;;  %v707_v3 = vrot.slane %v659_v18, 4 }
 0x126   : > { %v650_v22 = vmul.f32 %v1488_v8, %v552_v4  ;;  %v661_v20 = vmul.f32 %v1489_v60, %v563_v37  ;;  %v548_v62 = vmul.f32 0.6931472, %v929_v27  ;;  %v1491_v12 = vrot.slane %v1210_v14, %v1236_v38 }
 0x127   : > { %v651_v31 = vmul.f32 %v1490_v28, %v553_v33  ;;  %v704_v10 = vsel %vm684_vm7, %v703_v43, %v702_v34  ;;  %v683_v54 = vrot.slane %v649_v16, 6  ;;  %v709_v40 = vrot.slane %v660_v9, 3 }
 0x128   : > { %v652_v24 = vmul.f32 %v1491_v12, %v554_v39  ;;  %v931_v53 = vpop.eup %930  ;;  %v564_v50 = vadd.f32 %v548_v62, %v436_v36  ;;  %v1492_v49 = vrot.slane %v1210_v14, %v1251_v61  ;;  %v686_v29 = vrot.slane %v650_v22, 5 }
 0x129   : > { %v428_v25 = vsub.f32 %v314_v52, %v412_v2  ;;  %v532_v51 = vmul.f32 0.6931472, %v931_v53  ;;  %v711_v63 = vrot.slane %v661_v20, 2  ;;  %v689_v17 = vrot.slane %v651_v31, 4 }
 0x12a   : > { %v653_v23 = vmul.f32 %v1492_v49, %v555_v15  ;;  %v1493_v59 = vrot.slane %v1275_v30, %v1256_v6  ;;  %v685_v5 = vsel %vm684_vm7, %v683_v54, %v682_v32  ;;  %v706_v47 = vsel %vm687_vm9, %v705_v41, %v704_v10 }
 0x12b   : > { %v692_v46 = vrot.slane %v652_v24, 3  ;;  %v556_v21 = vadd.f32 %v532_v51, %v428_v25  ;;  %v708_v13 = vsel %vm690_vm8, %v707_v3, %v706_v47  ;;  %v1494_v0 = vrot.slane %v1210_v14, %v1256_v6 }
 0x12c   : > { %v662_v38 = vmul.f32 %v1493_v59, %v564_v50  ;;  %v695_v61 = vrot.slane %v653_v23, 2  ;;  %v710_v7 = vsel %vm693_vm10, %v709_v40, %v708_v13  ;;  %v688_v30 = vsel %vm687_vm9, %v686_v29, %v685_v5 }
 0x12d   : > { %v654_v19 = vmul.f32 %v1494_v0, %v556_v21  ;;  %v712_v48 = vsel %vm696_vm11, %v711_v63, %v710_v7  ;;  %v691_v4 = vsel %vm690_vm8, %v689_v17, %v688_v30 }
 0x12e   : > { %v713_v26 = vrot.slane %v662_v38, 1  ;;  %v694_v42 = vsel %vm693_vm10, %v692_v46, %v691_v4 }
 0x12f   : > { %v698_v44 = vrot.slane %v654_v19, 1  ;;  %v697_v45 = vsel %vm696_vm11, %v695_v61, %v694_v42 }
 0x130   : > { %v714_v37 = vsel %vm699_vm12, %v713_v26, %v712_v48 }
 0x131   : > { %v719_v33 = vsel %vm717_vm13, %v714_v37, 0.0  ;;  %v700_v52 = vsel %vm699_vm12, %v698_v44, %v697_v45 }
 0x132   : > { %v718_v56 = vsel %vm717_vm13, %v700_v52, 0.0 }
 0x133   : > { %v720_v57 = vadd.f32 %v719_v33, %v718_v56 }
 0x135   : > { %721 = vadd.xlane.f32.xlu0 %v720_v57 }
 0x1be   : > { %v722_v14 = vpop.xlane.xlu0 %721 }
 0x1bf   : > { %v723_v6 = vrot.slane %v722_v14, 4 }
 0x1c1   : > { %v724_v55 = vadd.f32 %v723_v6, %v722_v14 }
 0x1c3   : > { %v725_v18 = vrot.slane %v724_v55, 2 }
 0x1c5   : > { %v726_v39 = vadd.f32 %v725_v18, %v724_v55 }
 0x1c7   : > { %v727_v58 = vrot.slane %v726_v39, 1 }
 0x1c9   : > { %v728_v2 = vadd.f32 %v727_v58, %v726_v39 }
 0x1cb   : > { %822 = vpush %v728_v2 }
 0x1fc   : > { %s823_s1 = spop %822  ;;  %737 = sbr.rel (%p815_p12) target bundleno = 581 (0x245), region = 47 }
 0x1fd   : > { %v730_v16 = vstv %s823_s1 }
 0x1fe   : > { %v731_v34 = vadd.f32 %v730_v16, %v663_v1 }
 0x200   : > { %733 = vst.msk [vmem:[#allocation4] sm:$0x1] %vm732_vm14, %v731_v34 }
 0x201   : > { %v742_v9 = vstv %s741_s24 }
 0x202   : > { %932 = vrcp.f32 %v742_v9 }
 0x207   : > { %v738_v11 = vld [vmem:[#allocation4] sm:$0x1] }
 0x208   : > { %824 = vpush %v738_v11 }
 0x20f   : > { %v933_v15 = vpop.eup %932 }
 0x210   : > { %826 = vpush %v933_v15 }
 0x239   : > { %s825_s3 = spop %824 }
 0x241   : > { %s827_s27 = spop %826 }
 0x242   : > { %s745_s28 = smul.f32 %s827_s27, %s825_s3 }
 0x244   : > { %747 = sst [smem:[#allocation12]] %s745_s28 }
 0x245 PF: > { %p842_p13 = scmp.eq.s32.totalorder %s1068_s26, 1  ;;  %s1027_s29 = smov [#allocation12]  }
 0x247   : > { %833 = dma.smem_to_hbm (%p842_p13), %s1027_s29, 16, %s1472_s4, [#allocation11]  }
 0x248   : > { %1009 = dma.done.wait (%p842_p13), [#allocation11], 16  }
 0x249   : > { %1011 = vsyncadd (%p842_p13), [#allocation11], 4294967280 }
 0x24a   : > { %761 = sfence }
 0x24b PF: > { %s27_s25 = sadd.s32 1, %s1014_s25  }
 0x24c   : > { %p24_p0 = scmp.ge.s32.totalorder %s27_s25, 4  }
 0x24e   :  { %26 = sbr.rel (!%p24_p0) target bundleno = 27 (0x1b), region = 88 }
 0x253   :  { %767 = vsyncpa [#allocation10], 1 }
 0x254   :  { %769 = vsyncpa [#allocation10 + $0x1], 1 }
 0x255   :  { %770 = vsyncpa [#allocation11], 1 }
 0x256   :  { %772 = vsyncpa [#allocation11 + $0x1], 1 }

</bundles_post_ra>
